<compile_context>
chip_gen: v5e
topology: v5e:2x2
jax: 0.10.0
libtpu: 0.0.40
codegen_flags: <defaults>
</compile_context>

<pallas_src>
import jax
import jax.numpy as jnp
from jax.experimental import pallas as pl
from jax.experimental.pallas import tpu as pltpu

EPS = 1e-5
NEG_SLOPE = 0.1
LANES = 128


def _leaky_relu(h):
    # LeakyReLU(0.1) == max(h, 0.1*h) for 0 < slope < 1: mul+max instead of
    # cmp+mul+select.
    return jnp.maximum(h, NEG_SLOPE * h)


def _bn(h, g, b, m, v):
    # Reference-side BatchNorm1d (eval): h:(B,N); g/b/m/v:(1,N)
    return (h - m) * jax.lax.rsqrt(v + EPS) * g + b


def _round_up(n, m):
    return (n + m - 1) // m * m


# ---------------------------------------------------------------------------
# Kernel (batch on the lane axis everywhere)
# ---------------------------------------------------------------------------
def goldprice_kernel(xt_ref, w1t_ref, b1_ref, w2t_ref, b2_ref, w3_ref, b3_ref,
                     out_ref):
    # xt  : (F,  TB) bf16   input tile, batch on lanes (transposed on host)
    # w1t : (H1, F)  bf16   fc1 + bn1 folded (transposed);  b1: (H1, 1) f32
    # w2t : (H2, H1) bf16   fc2 + bn2 folded (transposed);  b2: (H2, 1) f32
    # w3  : (H2, 1)  f32    fc3 + bn3 folded (VPU/XLU path); b3: (1,) SMEM
    # out : (1,  TB) f32    lane-dense output row
    xt = xt_ref[...]

    # fc1 (+bn1 folded) -> LeakyReLU(0.1)    (dropout1 = identity in eval)
    h = jnp.dot(w1t_ref[...], xt, preferred_element_type=jnp.float32)
    h = _leaky_relu(h + b1_ref[...])                         # (H1, TB) f32

    # fc2 (+bn2 folded) -> LeakyReLU(0.1)    (dropout2 = identity in eval)
    h = jnp.dot(w2t_ref[...], h.astype(jnp.bfloat16),
                preferred_element_type=jnp.float32)
    h = _leaky_relu(h + b2_ref[...])                         # (H2, TB) f32

    # fc3 (+bn3 folded): 32 -> 1.  Kept off the MXU: VPU multiply + 32-row
    # sublane (XLU) reduction; result is already lane-major (1, TB), so the
    # epilogue is a single dense store.
    y = jnp.sum(h * w3_ref[...], axis=0, keepdims=True) + b3_ref[0]
    out_ref[...] = y.astype(out_ref.dtype)


# ---------------------------------------------------------------------------
# Host-side parameter folding + wrapper
# ---------------------------------------------------------------------------
def fold_bn_params(params):
    """Fold eval-mode BatchNorm1d (+ linear bias) into the matmul weights,
    transpose for the batch-on-lanes layout, and cast MXU operands to bf16."""
    folded = {}
    for i in (1, 2, 3):
        s = params[f"g{i}"] * jax.lax.rsqrt(params[f"v{i}"] + EPS)      # (1,N)
        folded[f"w{i}"] = params[f"w{i}"] * s                           # (in,N)
        folded[f"b{i}"] = (params[f"b{i}"] - params[f"m{i}"]) * s + params[f"be{i}"]
    return {
        "w1t": folded["w1"].T.astype(jnp.bfloat16),   # (64, F)  MXU operand
        "b1":  folded["b1"].T,                        # (64, 1)  f32
        "w2t": folded["w2"].T.astype(jnp.bfloat16),   # (32, 64) MXU operand
        "b2":  folded["b2"].T,                        # (32, 1)  f32
        "w3":  folded["w3"],                          # (32, 1)  f32 (VPU path)
        "b3":  folded["b3"].reshape(1),               # (1,)     SMEM scalar
    }


def goldprice_forward(x, params, *, block_cols=8192):
    """x: (B, input_size) f32; params: raw (unfolded) parameter dict."""
    B, F = x.shape
    fp = fold_bn_params(params)
    h1 = fp["w1t"].shape[0]
    h2 = fp["w2t"].shape[0]

    # Batch tiling.  The batch sits on the lane axis, so tiles are multiples
    # of 128 lanes.  Pad B only to a lane multiple, size tiles to split the
    # batch evenly (no huge junk tail), and keep >= 2 (even) tiles when the
    # batch allows it so the "parallel" axis shards across v7x's two TCs.
    b_pad = _round_up(B, LANES)
    nt = pl.cdiv(b_pad, block_cols)
    if b_pad >= 2 * LANES:
        nt = max(nt, 2)
        nt += nt % 2
    tb = _round_up(pl.cdiv(b_pad, nt), LANES)
    b_final = _round_up(b_pad, tb)
    num_tiles = b_final // tb

    # One host-side transpose + bf16 cast: (B, F) f32 -> (F, b_final) bf16.
    xt = jnp.pad(x, ((0, b_final - B), (0, 0))).astype(jnp.bfloat16).T

    def resident(shape):
        # Full-array block, stays in VMEM across all grid steps.
        return pl.BlockSpec(shape, lambda i: (0,) * len(shape))

    out = pl.pallas_call(
        goldprice_kernel,
        out_shape=jax.ShapeDtypeStruct((1, b_final), jnp.float32),
        grid=(num_tiles,),
        in_specs=[
            pl.BlockSpec((F, tb), lambda i: (0, i)),            # xt batch tile
            resident((h1, F)), resident((h1, 1)),               # fc1' / b1'
            resident((h2, h1)), resident((h2, 1)),              # fc2' / b2'
            resident((h2, 1)),                                  # fc3' column
            pl.BlockSpec(memory_space=pltpu.MemorySpace.SMEM),  # b3' scalar
        ],
        out_specs=pl.BlockSpec((1, tb), lambda i: (0, i)),      # lane-dense
        compiler_params=pltpu.CompilerParams(
            dimension_semantics=("parallel",),
            vmem_limit_bytes=64 * 1024 * 1024,
        ),
    )(xt, fp["w1t"], fp["b1"], fp["w2t"], fp["b2"], fp["w3"], fp["b3"])

    # (1, b_final) lane-major row -> (B, 1); padded lanes dropped.
    return out.reshape(-1, 1)[:B]


# ---------------------------------------------------------------------------
# Parameters + pure-JAX reference (unfused, f32, for correctness check)
# ---------------------------------------------------------------------------
def init_params(key, input_size):
    """Deterministic synthetic parameters matching GoldPriceNN(input_size)."""
    sizes = [(input_size, 64), (64, 32), (32, 1)]
    params = {}
    for i, (fan_in, fan_out) in enumerate(sizes, start=1):
        key, kw, kb, kg, kbe, km, kv = jax.random.split(key, 7)
        bound = 1.0 / jnp.sqrt(fan_in)
        params[f"w{i}"] = jax.random.uniform(
            kw, (fan_in, fan_out), jnp.float32, -bound, bound)
        params[f"b{i}"] = jax.random.uniform(
            kb, (1, fan_out), jnp.float32, -bound, bound)
        # BatchNorm1d params / running stats (shape (1, N) for broadcasting)
        params[f"g{i}"] = 1.0 + 0.1 * jax.random.normal(kg, (1, fan_out), jnp.float32)
        params[f"be{i}"] = 0.1 * jax.random.normal(kbe, (1, fan_out), jnp.float32)
        params[f"m{i}"] = 0.1 * jax.random.normal(km, (1, fan_out), jnp.float32)
        params[f"v{i}"] = jax.random.uniform(
            kv, (1, fan_out), jnp.float32, 0.5, 1.5)
    return params


def reference_forward(x, p):
    """Pure-JAX reference with UNFUSED BatchNorm (same inference semantics)."""
    h = x @ p["w1"] + p["b1"]
    h = jnp.where(h >= 0, h, NEG_SLOPE * h)  # LeakyReLU, reference form
    # (original order: fc -> bn -> activation)
    h = x @ p["w1"] + p["b1"]
    h = jnp.where((t := _bn(h, p["g1"], p["be1"], p["m1"], p["v1"])) >= 0, t, NEG_SLOPE * t)
    h = h @ p["w2"] + p["b2"]
    h = jnp.where((t := _bn(h, p["g2"], p["be2"], p["m2"], p["v2"])) >= 0, t, NEG_SLOPE * t)
    h = h @ p["w3"] + p["b3"]
    h = _bn(h, p["g3"], p["be3"], p["m3"], p["v3"])
    return h


if __name__ == "__main__":
    input_size = 16
    batch = 8

    key = jax.random.PRNGKey(0)
    key, kx = jax.random.split(key)
    x = jax.random.normal(kx, (batch, input_size), jnp.float32)
    params = init_params(key, input_size)

    out = goldprice_forward(x, params)
    out = jax.block_until_ready(out)

    ref = reference_forward(x, params)
    assert out.shape == (batch, 1), out.shape
    # bf16 MXU operands (vs. f32 reference): allow bf16-level tolerance.
    assert jnp.allclose(out, ref, atol=2e-2, rtol=2e-2), (out, ref)

    print("KERNEL_OK")
</pallas_src>

<mosaic_0001>
module attributes {stable_mosaic.version = 11 : i64} {
  func.func @goldprice_kernel(%arg0: i32, %arg1: memref<16x128xbf16, #tpu.memory_space<vmem>>, %arg2: memref<64x16xbf16, #tpu.memory_space<vmem>>, %arg3: memref<64x1xf32, #tpu.memory_space<vmem>>, %arg4: memref<32x64xbf16, #tpu.memory_space<vmem>>, %arg5: memref<32x1xf32, #tpu.memory_space<vmem>>, %arg6: memref<32x1xf32, #tpu.memory_space<vmem>>, %arg7: memref<1xf32, #tpu.memory_space<smem>>, %arg8: memref<1x128xf32, #tpu.memory_space<vmem>>) attributes {dimension_semantics = [#tpu.dimension_semantics<parallel>], iteration_bounds = array<i64: 1>, scalar_prefetch = 0 : i64, scratch_operands = 0 : i64, tpu.core_type = #tpu.core_type<tc>, window_params = [{transform_indices = @transform_0, window_bounds = array<i64: 16, 128>}, {pipeline_mode = #tpu.pipeline_mode<synchronous>, transform_indices = @transform_1, window_bounds = array<i64: 64, 16>}, {pipeline_mode = #tpu.pipeline_mode<synchronous>, transform_indices = @transform_2, window_bounds = array<i64: 64, 1>}, {pipeline_mode = #tpu.pipeline_mode<synchronous>, transform_indices = @transform_3, window_bounds = array<i64: 32, 64>}, {pipeline_mode = #tpu.pipeline_mode<synchronous>, transform_indices = @transform_4, window_bounds = array<i64: 32, 1>}, {pipeline_mode = #tpu.pipeline_mode<synchronous>, transform_indices = @transform_5, window_bounds = array<i64: 32, 1>}, {transform_indices = @transform_6, window_bounds = array<i64: 1>}, {transform_indices = @transform_7, window_bounds = array<i64: 1, 128>}]} {
    %c0 = arith.constant 0 : index
    %c0_0 = arith.constant 0 : index
    %0 = vector.load %arg1[%c0, %c0_0] : memref<16x128xbf16, #tpu.memory_space<vmem>>, vector<16x128xbf16>
    %c0_1 = arith.constant 0 : index
    %c0_2 = arith.constant 0 : index
    %1 = vector.load %arg2[%c0_1, %c0_2] : memref<64x16xbf16, #tpu.memory_space<vmem>>, vector<64x16xbf16>
    %cst = arith.constant dense<0.000000e+00> : vector<64x128xf32>
    %2 = tpu.matmul %1, %0, %cst {dimension_numbers = #tpu.dot_dimension_numbers<[1], [0], [0], [1], [0, 0, 1, 1], [], []>} : vector<64x16xbf16>, vector<16x128xbf16>, vector<64x128xf32> -> vector<64x128xf32>
    %c0_3 = arith.constant 0 : index
    %c0_4 = arith.constant 0 : index
    %3 = vector.load %arg3[%c0_3, %c0_4] : memref<64x1xf32, #tpu.memory_space<vmem>>, vector<64x1xf32>
    %4 = vector.broadcast %3 : vector<64x1xf32> to vector<64x128xf32>
    %5 = arith.addf %2, %4 : vector<64x128xf32>
    %cst_5 = arith.constant 1.000000e-01 : f32
    %6 = vector.broadcast %cst_5 : f32 to vector<64x128xf32>
    %7 = arith.mulf %6, %5 : vector<64x128xf32>
    %8 = arith.maximumf %5, %7 : vector<64x128xf32>
    %c0_6 = arith.constant 0 : index
    %c0_7 = arith.constant 0 : index
    %9 = vector.load %arg4[%c0_6, %c0_7] : memref<32x64xbf16, #tpu.memory_space<vmem>>, vector<32x64xbf16>
    %10 = arith.truncf %8 : vector<64x128xf32> to vector<64x128xbf16>
    %cst_8 = arith.constant dense<0.000000e+00> : vector<32x128xf32>
    %11 = tpu.matmul %9, %10, %cst_8 {dimension_numbers = #tpu.dot_dimension_numbers<[1], [0], [0], [1], [0, 0, 1, 1], [], []>} : vector<32x64xbf16>, vector<64x128xbf16>, vector<32x128xf32> -> vector<32x128xf32>
    %c0_9 = arith.constant 0 : index
    %c0_10 = arith.constant 0 : index
    %12 = vector.load %arg5[%c0_9, %c0_10] : memref<32x1xf32, #tpu.memory_space<vmem>>, vector<32x1xf32>
    %13 = vector.broadcast %12 : vector<32x1xf32> to vector<32x128xf32>
    %14 = arith.addf %11, %13 : vector<32x128xf32>
    %cst_11 = arith.constant 1.000000e-01 : f32
    %15 = vector.broadcast %cst_11 : f32 to vector<32x128xf32>
    %16 = arith.mulf %15, %14 : vector<32x128xf32>
    %17 = arith.maximumf %14, %16 : vector<32x128xf32>
    %c0_12 = arith.constant 0 : index
    %c0_13 = arith.constant 0 : index
    %18 = vector.load %arg6[%c0_12, %c0_13] : memref<32x1xf32, #tpu.memory_space<vmem>>, vector<32x1xf32>
    %19 = vector.broadcast %18 : vector<32x1xf32> to vector<32x128xf32>
    %20 = arith.mulf %17, %19 : vector<32x128xf32>
    %cst_14 = arith.constant dense<0.000000e+00> : vector<128xf32>
    %21 = vector.multi_reduction <add>, %20, %cst_14 [0] : vector<32x128xf32> to vector<128xf32>
    %22 = vector.shape_cast %21 : vector<128xf32> to vector<1x128xf32>
    %c0_15 = arith.constant 0 : index
    %23 = memref.load %arg7[%c0_15] : memref<1xf32, #tpu.memory_space<smem>>
    %24 = vector.broadcast %23 : f32 to vector<1x128xf32>
    %25 = arith.addf %22, %24 : vector<1x128xf32>
    %c0_16 = arith.constant 0 : index
    %c0_17 = arith.constant 0 : index
    %26 = vector.load %arg8[%c0_16, %c0_17] : memref<1x128xf32, #tpu.memory_space<vmem>>, vector<1x128xf32>
    tpu.vector_store %arg8[%c0_16, %c0_17], %25 {strides = array<i32>} : memref<1x128xf32, #tpu.memory_space<vmem>>, vector<1x128xf32>,
    return
  }
  func.func @transform_0(%arg0: i32) -> (i32, i32) {
    %c0_i32 = arith.constant 0 : i32
    %c0_i32_0 = arith.constant 0 : i32
    return %c0_i32, %arg0 : i32, i32
  }
  func.func @transform_1(%arg0: i32) -> (i32, i32) {
    %c0_i32 = arith.constant 0 : i32
    %c0_i32_0 = arith.constant 0 : i32
    %c0_i32_1 = arith.constant 0 : i32
    return %c0_i32, %c0_i32_0 : i32, i32
  }
  func.func @transform_2(%arg0: i32) -> (i32, i32) {
    %c0_i32 = arith.constant 0 : i32
    %c0_i32_0 = arith.constant 0 : i32
    %c0_i32_1 = arith.constant 0 : i32
    return %c0_i32, %c0_i32_0 : i32, i32
  }
  func.func @transform_3(%arg0: i32) -> (i32, i32) {
    %c0_i32 = arith.constant 0 : i32
    %c0_i32_0 = arith.constant 0 : i32
    %c0_i32_1 = arith.constant 0 : i32
    return %c0_i32, %c0_i32_0 : i32, i32
  }
  func.func @transform_4(%arg0: i32) -> (i32, i32) {
    %c0_i32 = arith.constant 0 : i32
    %c0_i32_0 = arith.constant 0 : i32
    %c0_i32_1 = arith.constant 0 : i32
    return %c0_i32, %c0_i32_0 : i32, i32
  }
  func.func @transform_5(%arg0: i32) -> (i32, i32) {
    %c0_i32 = arith.constant 0 : i32
    %c0_i32_0 = arith.constant 0 : i32
    %c0_i32_1 = arith.constant 0 : i32
    return %c0_i32, %c0_i32_0 : i32, i32
  }
  func.func @transform_6(%arg0: i32) -> i32 {
    %c0_i32 = arith.constant 0 : i32
    %c0_i32_0 = arith.constant 0 : i32
    return %c0_i32 : i32
  }
  func.func @transform_7(%arg0: i32) -> (i32, i32) {
    %c0_i32 = arith.constant 0 : i32
    %c0_i32_0 = arith.constant 0 : i32
    return %c0_i32, %arg0 : i32, i32
  }
}

</mosaic_0001>

<bundles_post_ra>
// kernel: tpu_custom_call.1
= control target key start
LH: loop header
LB: loop body
LE: loop exit
PB: predicated region body
PF: predicated region fallthrough
CT: control target
= control target key end

     0   :  { %v381_v2 = vmov 0   ;;  %vm113_vm0 = vcmask 130048   ;;  %s502_s0 = inlined_call_operand.vmem [shape: bf16[16,128], index: 0, kind: input, shape index: {}]   ;;  %s503_s1 = inlined_call_operand.vmem [shape: bf16[64,16], index: 1, kind: input, shape index: {}]   ;;  %s504_s2 = inlined_call_operand.vmem [shape: f32[64,1], index: 2, kind: input, shape index: {}]   ;;  %s505_s3 = inlined_call_operand.vmem [shape: bf16[32,64], index: 3, kind: input, shape index: {}]   ;;  %s506_s4 = inlined_call_operand.vmem [shape: f32[32,1], index: 4, kind: input, shape index: {}]   ;;  %s507_s5 = inlined_call_operand.vmem [shape: f32[32,1], index: 5, kind: input, shape index: {}]   ;;  %s508_s6 = inlined_call_operand.<no memory space> [shape: f32[1], index: 6, kind: input, shape index: {}]   ;;  %s509_s7 = inlined_call_operand.hbm [shape: f32[1,128], index: 7, kind: output, shape index: {}]  }
   0x1   :  { %v45_v0 = vld [vmem:[%s504_s2 + $0x30] sm:$0xff]  ;;  %v338_v1 = vld [vmem:[%s502_s0] sm:$0xff]  ;;  %352 = vset.pattern.permute.xlu0 %v381_v2  ;;  %353 = vset.pattern.permute.xlu1 %v381_v2 }
   0x2   :  { %v341_v3 = vld [vmem:[%s503_s1 + $0x10] sm:$0xff]  ;;  %v43_v4 = vld [vmem:[%s504_s2 + $0x20] sm:$0xff]  ;;  %79 = vperm.xlu0 %352, %v45_v0   ;;  %345 = vmatpush.bf16.msra.mxu2 %v338_v1 }
   0x3   :  { %v339_v5 = vld [vmem:[%s503_s1] sm:$0xff]  ;;  %133 = vmatpush.bf16.msra.mxu0 %v338_v1  ;;  %69 = vperm.xlu1 %353, %v43_v4   ;;  %v41_v6 = vld [vmem:[%s504_s2 + $0x10] sm:$0xff] }
   0x4   :  { %354 = vset.pattern.permute.xlu2 %v381_v2 }
   0x5   :  { %326 = vmatmul.msk.bf16.vlgmr.msra.gmra.mxu2 %vm113_vm0, %v341_v3  ;;  %59 = vperm.xlu2 %354, %v41_v6  }
   0x6   :  { %13 = vsyncpa [#allocation4], 0  ;;  %324 = vmatmul.msk.bf16.vlgmr.msra.gmra.mxu0 %vm113_vm0, %v339_v5  ;;  %v46_v7 = vld [vmem:[%s504_s2 + $0x38] sm:$0xff]  ;;  %v44_v8 = vld [vmem:[%s504_s2 + $0x28] sm:$0xff]  ;;  %vm213_vm1 = vcmask 523264   ;;  %s382_s19 = smov [#allocation3]  }
   0x7   :  { %v42_v9 = vld [vmem:[%s504_s2 + $0x18] sm:$0xff]  ;;  %v39_v10 = vld [vmem:[%s504_s2] sm:$0xff]  ;;  %v40_v11 = vld [vmem:[%s504_s2 + $0x8] sm:$0xff]  ;;  %s293_s20 = sshll.u32 %s382_s19, 4  ;;  %s295_s23 = sshll.u32 %s509_s7, 4  ;;  %s294_s20 = int_to_ptr.vmem [resolvable:$true] %s293_s20  ;;  %s296_s23 = int_to_ptr.hbm [resolvable:$true] %s295_s23 }
   0x8   :  { %v342_v12 = vld [vmem:[%s503_s1 + $0x18] sm:$0xff]  ;;  %v340_v13 = vld [vmem:[%s503_s1 + $0x8] sm:$0xff]  ;;  %v179_v14 = vld [vmem:[%s506_s4] sm:$0xff] }
   0x9   :  { %v180_v15 = vld [vmem:[%s506_s4 + $0x8] sm:$0xff]  ;;  %v181_v16 = vld [vmem:[%s506_s4 + $0x10] sm:$0xff]  ;;  %v182_v17 = vld [vmem:[%s506_s4 + $0x18] sm:$0xff] }
   0xa   :  { %84 = vperm.xlu0 %352, %v46_v7   ;;  %v247_v18 = vld [vmem:[%s507_s5] sm:$0xff]  ;;  %v248_v19 = vld [vmem:[%s507_s5 + $0x8] sm:$0xff]  ;;  %v249_v20 = vld [vmem:[%s507_s5 + $0x10] sm:$0xff] }
   0xb   :  { %74 = vperm.xlu1 %353, %v44_v8   ;;  %v250_v21 = vld [vmem:[%s507_s5 + $0x18] sm:$0xff]  ;;  %v343_v2 = vld [vmem:[%s505_s3] sm:$0xff]  ;;  %v344_v3 = vld [vmem:[%s505_s3 + $0x8] sm:$0xff] }
   0xd   :  { %64 = vperm.xlu2 %354, %v42_v9  }
  0x12   :  { %49 = vperm.xlu0 %352, %v39_v10  }
  0x13   :  { %54 = vperm.xlu1 %353, %v40_v11  }
  0x15   :  { %327 = vmatmul.msk.bf16.gmra.mxu2 %vm113_vm0, %v342_v12  ;;  %185 = vperm.xlu2 %354, %v179_v14  }
  0x16   :  { %325 = vmatmul.msk.bf16.gmra.mxu0 %vm113_vm0, %v340_v13 }
  0x1a   :  { %190 = vperm.xlu0 %352, %v180_v15  }
  0x1b   :  { %195 = vperm.xlu1 %353, %v181_v16  }
  0x1d   :  { %200 = vperm.xlu2 %354, %v182_v17  }
  0x22   :  { %253 = vperm.xlu0 %352, %v247_v18  }
  0x23   :  { %258 = vperm.xlu1 %353, %v248_v19  }
  0x25   :  { %263 = vperm.xlu2 %354, %v249_v20  }
  0x2a   :  { %268 = vperm.xlu0 %352, %v250_v21  }
  0x5f   :  { %v60_v29 = vpop.permute.xlu2 %59 }
  0x67   :  { %v65_v40 = vpop.permute.xlu2 %64 }
  0x6f   :  { %v186_v4 = vpop.permute.xlu2 %185 }
  0x74   :  { %v80_v26 = vpop.permute.xlu0 %79 }
  0x75   :  { %v70_v27 = vpop.permute.xlu1 %69 }
  0x77   :  { %v201_v12 = vpop.permute.xlu2 %200 }
  0x7c   :  { %v85_v31 = vpop.permute.xlu0 %84 }
  0x7d   :  { %v75_v32 = vpop.permute.xlu1 %74 }
  0x83   :  { %v135_v22 = vpop.f32.mrf.mxu0 }
  0x84   :  { %v50_v45 = vpop.permute.xlu0 %49 }
  0x85   :  { %v55_v47 = vpop.permute.xlu1 %54  ;;  %v136_v50 = vadd.f32 %v135_v22, %v50_v45 }
  0x87   :  { %v155_v57 = vmul.f32 0.1, %v136_v50 }
  0x88   :  { %v145_v23 = vpop.f32.mrf.mxu2 }
  0x89   :  { %v146_v37 = vadd.f32 %v145_v23, %v70_v27  ;;  %v163_v62 = vmax.f32 %v136_v50, %v155_v57 }
  0x8b   :  { %v137_v24 = vpop.f32.mrf.mxu0  ;;  %v159_v46 = vmul.f32 0.1, %v146_v37 }
  0x8c   :  { %v138_v51 = vadd.f32 %v137_v24, %v55_v47  ;;  %v191_v5 = vpop.permute.xlu0 %190 }
  0x8d   :  { %v167_v56 = vmax.f32 %v146_v37, %v159_v46  ;;  %v196_v8 = vpop.permute.xlu1 %195 }
  0x8e   :  { %v156_v58 = vmul.f32 0.1, %v138_v51 }
  0x90   :  { %v147_v25 = vpop.f32.mrf.mxu2  ;;  %v164_v63 = vmax.f32 %v138_v51, %v156_v58 }
  0x91   :  { %v148_v34 = vadd.f32 %v147_v25, %v75_v32 }
  0x92   :  { %v175_v1 = vpack.c.bf16 %v164_v63, %v163_v62 }
  0x93   :  { %v140_v28 = vpop.f32.mrf.mxu0  ;;  %v160_v41 = vmul.f32 0.1, %v148_v34 }
  0x94   :  { %v141_v42 = vadd.f32 %v140_v28, %v60_v29  ;;  %v254_v15 = vpop.permute.xlu0 %253  ;;  %v264_v28 = vpop.permute.xlu2 %263 }
  0x95   :  { %v168_v52 = vmax.f32 %v148_v34, %v160_v41  ;;  %v259_v20 = vpop.permute.xlu1 %258 }
  0x96   :  { %v157_v53 = vmul.f32 0.1, %v141_v42 }
  0x97   :  { %v177_v61 = vpack.c.bf16 %v168_v52, %v167_v56 }
  0x98   :  { %v150_v30 = vpop.f32.mrf.mxu2  ;;  %v165_v59 = vmax.f32 %v141_v42, %v157_v53 }
  0x99   :  { %v151_v33 = vadd.f32 %v150_v30, %v80_v26 }
  0x9b   :  { %v142_v35 = vpop.f32.mrf.mxu0  ;;  %v161_v38 = vmul.f32 0.1, %v151_v33 }
  0x9c   :  { %v143_v43 = vadd.f32 %v142_v35, %v65_v40  ;;  %v285_v40 = vstv %s508_s6 }
  0x9d   :  { %v169_v48 = vmax.f32 %v151_v33, %v161_v38 }
  0x9e   :  { %v158_v54 = vmul.f32 0.1, %v143_v43 }
  0xa0   :  { %v152_v36 = vpop.f32.mrf.mxu2  ;;  %v166_v60 = vmax.f32 %v143_v43, %v158_v54 }
  0xa1   :  { %v153_v39 = vadd.f32 %v152_v36, %v85_v31  ;;  %v269_v31 = vpop.permute.xlu0 %268 }
  0xa2   :  { %v176_v0 = vpack.c.bf16 %v166_v60, %v165_v59 }
  0xa3   :  { %v162_v44 = vmul.f32 0.1, %v153_v39 }
  0xa5   :  { %v170_v49 = vmax.f32 %v153_v39, %v162_v44 }
  0xa7   :  { %v178_v55 = vpack.c.bf16 %v170_v49, %v169_v48 }
  0xa9   :  { %224 = vmatpush.bf16.msra.mxu1 %v178_v55  ;;  %346 = vmatpush.bf16.msra.mxu3 %v178_v55 }
  0xad   :  { %225 = vmatpush.bf16.msra.mxu1 %v177_v61  ;;  %347 = vmatpush.bf16.msra.mxu3 %v177_v61 }
  0xb1   :  { %226 = vmatpush.bf16.msra.mxu1 %v176_v0  ;;  %348 = vmatpush.bf16.msra.mxu3 %v176_v0 }
  0xb5   :  { %227 = vmatpush.bf16.msra.mxu1 %v175_v1  ;;  %349 = vmatpush.bf16.msra.mxu3 %v175_v1 }
  0xb8   :  { %336 = vmatmul.msk.bf16.vlgmr.msra.gmra.mxu1 %vm213_vm1, %v343_v2  ;;  %337 = vmatmul.msk.bf16.vlgmr.msra.gmra.mxu3 %vm213_vm1, %v344_v3 }
 0x135   :  { %v229_v6 = vpop.f32.mrf.mxu1 }
 0x136   :  { %v230_v7 = vadd.f32 %v229_v6, %v186_v4 }
 0x138   :  { %v239_v10 = vmul.f32 0.1, %v230_v7 }
 0x13a   :  { %v243_v16 = vmax.f32 %v230_v7, %v239_v10 }
 0x13b   :  { %v234_v9 = vpop.f32.mrf.mxu3 }
 0x13c   :  { %v235_v11 = vadd.f32 %v234_v9, %v196_v8  ;;  %v271_v22 = vmul.f32 %v254_v15, %v243_v16 }
 0x13d   :  { %v231_v13 = vpop.f32.mrf.mxu1 }
 0x13e   :  { %v232_v14 = vadd.f32 %v231_v13, %v191_v5  ;;  %v241_v17 = vmul.f32 0.1, %v235_v11 }
 0x140   :  { %v240_v18 = vmul.f32 0.1, %v232_v14  ;;  %v245_v23 = vmax.f32 %v235_v11, %v241_v17 }
 0x142   :  { %v244_v19 = vmax.f32 %v232_v14, %v240_v18  ;;  %v273_v29 = vmul.f32 %v264_v28, %v245_v23 }
 0x143   :  { %v236_v21 = vpop.f32.mrf.mxu3 }
 0x144   :  { %v272_v24 = vmul.f32 %v259_v20, %v244_v19  ;;  %v237_v25 = vadd.f32 %v236_v21, %v201_v12 }
 0x146   :  { %v275_v26 = vadd.f32 %v272_v24, %v271_v22  ;;  %v242_v27 = vmul.f32 0.1, %v237_v25 }
 0x148   :  { %v246_v30 = vmax.f32 %v237_v25, %v242_v27  ;;  %v276_v33 = vadd.f32 %v275_v26, %v273_v29 }
 0x14a   :  { %v274_v32 = vmul.f32 %v269_v31, %v246_v30 }
 0x14c   :  { %v277_v34 = vadd.f32 %v276_v33, %v274_v32 }
 0x14e   :  { %v278_v35 = vrot.slane %v277_v34, 4 }
 0x150   :  { %v279_v36 = vadd.f32 %v278_v35, %v277_v34 }
 0x152   :  { %v280_v37 = vrot.slane %v279_v36, 2 }
 0x154   :  { %v281_v38 = vadd.f32 %v280_v37, %v279_v36 }
 0x156   :  { %v282_v39 = vrot.slane %v281_v38, 1 }
 0x158   :  { %v283_v41 = vadd.f32 %v282_v39, %v281_v38 }
 0x15a   :  { %v286_v42 = vadd.f32 %v285_v40, %v283_v41 }
 0x15c   :  { %287 = vst [vmem:[#allocation3] sm:$0x1] %v286_v42 }
 0x15d   :  { %298 = dma.vmem_to_hbm [thread:$0]  %s294_s20, 16, %s296_s23, [#allocation4]  }
 0x15e   :  { %379 = dma.done.wait [#allocation4], 16  }
 0x15f   :  { %380 = vsyncadd [#allocation4], 4294967280 }
 0x160   :  { %303 = vsyncpa [#allocation4], 1 }

</bundles_post_ra>
